<compile_context>
chip_gen: v5e
topology: v5e:2x2
jax: 0.10.0
libtpu: 0.0.40
codegen_flags: <defaults>
</compile_context>

<pallas_src>
import functools

import jax
import jax.numpy as jnp
from jax.experimental import pallas as pl
from jax.experimental.pallas import tpu as pltpu


# ---------------------------------------------------------------------------
# Kernel: out = w[0] * x + sum_i w[i+1] * a_i     (f32 accumulation)
# Channel alignment is handled via the clamped index_map + in-kernel masking.
# ---------------------------------------------------------------------------
def _fusion_kernel(nc, cb, ch_axis, acs, use_weight, w_ref, x_ref, *rest):
    a_refs, o_ref = rest[:-1], rest[-1]
    acc = x_ref[...].astype(jnp.float32)
    if use_weight:
        acc = acc * w_ref[0]
    for i, (a_ref, ac) in enumerate(zip(a_refs, acs)):
        contrib = a_ref[...].astype(jnp.float32)
        if use_weight:
            contrib = contrib * w_ref[i + 1]
        if ac < nc:
            # Zero channels >= ac (covers the block straddling ac and the
            # clamped, fully-out-of-range blocks) -> zero-pad-to-nc semantics.
            ch = (pl.program_id(ch_axis) * cb
                  + jax.lax.broadcasted_iota(jnp.int32, contrib.shape, 1))
            contrib = jnp.where(ch < ac, contrib, 0.0)
        acc = acc + contrib
    o_ref[...] = acc.astype(o_ref.dtype)


# ---------------------------------------------------------------------------
# Block-shape selection: big lane-dense blocks, bounded VMEM footprint.
# ---------------------------------------------------------------------------
def _choose_blocks(ch_counts, nc, hw, n_streams, itemsize):
    # Keep 2 (double-buffer) * n_streams * block_bytes under ~40 MiB (v7x
    # headroom under 64 MiB physical), individual blocks <= ~2 MiB.
    budget_bytes = max(8 * 128 * itemsize,
                       min(2 << 20, (40 << 20) // (2 * n_streams)))
    budget_elems = budget_bytes // itemsize

    if all(c % 8 == 0 for c in ch_counts):
        cb_max = min(ch_counts)                # all multiples of 8 (>= 8)
        if hw <= budget_elems // 8:
            sb = hw                            # full spatial (handles HW % 128 != 0)
            cb = min(cb_max, max(8, (budget_elems // hw) // 8 * 8))
        else:
            cb = 8                             # lane-dense: big spatial blocks
            sb = max(128, (budget_elems // 8) // 128 * 128)
    else:
        # Wrapper guarantees all channel counts equal nc on this path; use the
        # full channel dim so the block shape matches every array exactly.
        cb = nc
        if nc * hw <= budget_elems:
            sb = hw
        else:
            sb = max(128, (budget_elems // nc) // 128 * 128)
    return cb, sb


# ---------------------------------------------------------------------------
# Wrapper
# ---------------------------------------------------------------------------
def weighted_feature_fusion(x, outputs, layers, w_param=None, weight=False):
    """Pallas implementation of weightedFeatureFusion.forward (NCHW inputs)."""
    n = len(layers) + 1
    N, nc, H, W = x.shape
    HW = H * W

    if weight:
        assert w_param is not None
        w_vec = jax.nn.sigmoid(w_param.astype(jnp.float32)) * (2.0 / n)
    else:
        w_vec = jnp.ones((n,), jnp.float32)    # unused by the kernel (statically elided)

    fused = []
    for li in layers:
        a = outputs[li]
        assert a.shape[0] == N and a.shape[2:] == (H, W), "batch/spatial mismatch"
        fused.append(a)
    acs = [int(a.shape[1]) for a in fused]

    ch_counts = [nc] + acs
    if (not all(c == nc for c in ch_counts)
            and not all(c % 8 == 0 for c in ch_counts)):
        # Degenerate channel counts (mismatched AND not 8-aligned): fall back to
        # a JAX-side slice / zero-pad so one block shape fits every array. Real
        # darknet fusion layers never hit this (channels are multiples of 8).
        realigned = []
        for a, ac in zip(fused, acs):
            if ac > nc:
                a = a[:, :nc]
            elif ac < nc:
                a = jnp.pad(a, ((0, 0), (0, nc - ac), (0, 0), (0, 0)))
            realigned.append(a)
        fused, acs = realigned, [nc] * len(realigned)
        ch_counts = [nc] + acs

    itemsize = jnp.dtype(x.dtype).itemsize
    n_streams = 2 + len(fused)                 # x, out, a_i
    CB, SB = _choose_blocks(ch_counts, nc, HW, n_streams, itemsize)

    # Free (bitcast) reshapes: lanes = flattened spatial.
    x3 = x.reshape(N, nc, HW)
    a3 = [a.reshape(N, a.shape[1], HW) for a in fused]

    blk = (1, CB, SB)

    # Grid is (batch, spatial-blocks, channel-blocks); channel innermost so the
    # clamped a_i index_maps (ac < nc) repeat their block index on consecutive
    # steps and the pipeline skips the redundant DMA.
    def _idx(b, s, c, w):                      # trailing arg: prefetched w_vec ref
        return (b, c, s)

    x_spec = pl.BlockSpec(blk, _idx)
    a_specs = []
    for ac in acs:
        if ac < nc:
            # Channel blocks past a_i's extent are clamped to its last valid
            # block; the kernel masks their contribution to zero.
            last_blk = max((ac - 1) // CB, 0)
            a_specs.append(pl.BlockSpec(
                blk, lambda b, s, c, w, _lb=last_blk: (b, jnp.minimum(c, _lb), s)))
        else:
            # ac >= nc: the x-driven channel blocks only ever read a_i[:, :nc].
            a_specs.append(pl.BlockSpec(blk, _idx))

    grid = (N, pl.cdiv(HW, SB), pl.cdiv(nc, CB))
    kernel = functools.partial(_fusion_kernel, nc, CB, 2, tuple(acs), bool(weight))

    out = pl.pallas_call(
        kernel,
        out_shape=jax.ShapeDtypeStruct((N, nc, HW), x.dtype),
        grid_spec=pltpu.PrefetchScalarGridSpec(
            num_scalar_prefetch=1,
            grid=grid,
            in_specs=[x_spec] + a_specs,
            out_specs=pl.BlockSpec(blk, _idx),
        ),
        compiler_params=pltpu.CompilerParams(
            dimension_semantics=("parallel", "parallel", "parallel"),
            vmem_limit_bytes=64 * 1024 * 1024,
        ),
        # In-place fusion: operand 1 is x3 (index counts the scalar-prefetch arg).
        input_output_aliases={1: 0},
    )(w_vec, x3, *a3)

    return out.reshape(N, nc, H, W)


# ---------------------------------------------------------------------------
# Pure-JAX reference mirroring the PyTorch forward exactly.
# ---------------------------------------------------------------------------
def ref_fusion(x, outputs, layers, w_param=None, weight=False):
    n = len(layers) + 1
    x = x.astype(jnp.float32)
    if weight:
        w = jax.nn.sigmoid(w_param.astype(jnp.float32)) * (2.0 / n)
        x = x * w[0]
    nc = x.shape[1]
    for i in range(n - 1):
        a = outputs[layers[i]].astype(jnp.float32)
        if weight:
            a = a * w[i + 1]
        ac = a.shape[1]
        dc = nc - ac
        if dc > 0:
            x = x.at[:, :ac].add(a)
        elif dc < 0:
            x = x + a[:, :nc]
        else:
            x = x + a
    return x


if __name__ == "__main__":
    key = jax.random.PRNGKey(0)
    k0, k1, k2, k3 = jax.random.split(key, 4)

    # Darknet-like shapes: 13x13 feature maps (H*W = 169, NOT a multiple of
    # 128) and 8-aligned channel counts exercising all three fusion paths
    # (ac < nc, ac > nc, ac == nc).
    N, C, H, W = 2, 16, 13, 13
    layers = [-2, -3, -1]                      # -> ac = 24 (dc<0), 8 (dc>0), 16 (dc==0)
    weight = True
    w_param = jnp.zeros((len(layers) + 1,), jnp.float32)   # module init: zeros(n)

    x = jax.random.normal(k0, (N, C, H, W), jnp.float32)
    outputs = [
        jax.random.normal(k1, (N, 8, H, W), jnp.float32),    # idx -3: ac=8  < nc
        jax.random.normal(k2, (N, 24, H, W), jnp.float32),   # idx -2: ac=24 > nc
        jax.random.normal(k3, (N, 16, H, W), jnp.float32),   # idx -1: ac=16 == nc
    ]

    # Reference first (belt-and-suspenders w.r.t. the in-place output alias).
    y_ref = ref_fusion(x, outputs, layers, w_param=w_param, weight=weight)

    y = weighted_feature_fusion(x, outputs, layers, w_param=w_param, weight=weight)
    y = jax.block_until_ready(y)

    assert y.shape == y_ref.shape
    err = float(jnp.max(jnp.abs(y.astype(jnp.float32) - y_ref)))
    assert err < 1e-5, f"max abs err {err}"

    # Also exercise the unweighted path once (statically elided multiplies).
    y2 = weighted_feature_fusion(x, outputs, layers, weight=False)
    y2 = jax.block_until_ready(y2)
    y2_ref = ref_fusion(x, outputs, layers, weight=False)
    err2 = float(jnp.max(jnp.abs(y2.astype(jnp.float32) - y2_ref)))
    assert err2 < 1e-5, f"max abs err (unweighted) {err2}"

    print("KERNEL_OK")
</pallas_src>

<mosaic_0001>
module attributes {stable_mosaic.version = 11 : i64} {
  func.func @_fusion_kernel(%arg0: i32, %arg1: i32, %arg2: i32, %arg3: memref<4xf32, #tpu.memory_space<smem>>, %arg4: memref<1x8x169xf32, #tpu.memory_space<vmem>>, %arg5: memref<1x8x169xf32, #tpu.memory_space<vmem>>, %arg6: memref<1x8x169xf32, #tpu.memory_space<vmem>>, %arg7: memref<1x8x169xf32, #tpu.memory_space<vmem>>, %arg8: memref<1x8x169xf32, #tpu.memory_space<vmem>>) attributes {dimension_semantics = [#tpu.dimension_semantics<parallel>, #tpu.dimension_semantics<parallel>, #tpu.dimension_semantics<parallel>], iteration_bounds = array<i64: 2, 1, 2>, scalar_prefetch = 1 : i64, scratch_operands = 0 : i64, tpu.core_type = #tpu.core_type<tc>, window_params = [{transform_indices = @transform_0, window_bounds = array<i64: 1, 8, 169>}, {transform_indices = @transform_1, window_bounds = array<i64: 1, 8, 169>}, {transform_indices = @transform_2, window_bounds = array<i64: 1, 8, 169>}, {transform_indices = @transform_3, window_bounds = array<i64: 1, 8, 169>}, {transform_indices = @transform_4, window_bounds = array<i64: 1, 8, 169>}]} {
    %c0 = arith.constant 0 : index
    %c0_0 = arith.constant 0 : index
    %c0_1 = arith.constant 0 : index
    %0 = vector.load %arg4[%c0, %c0_0, %c0_1] : memref<1x8x169xf32, #tpu.memory_space<vmem>>, vector<1x8x169xf32>
    %c0_2 = arith.constant 0 : index
    %1 = memref.load %arg3[%c0_2] : memref<4xf32, #tpu.memory_space<smem>>
    %2 = vector.broadcast %1 : f32 to vector<1x8x169xf32>
    %3 = arith.mulf %0, %2 : vector<1x8x169xf32>
    %c0_3 = arith.constant 0 : index
    %c0_4 = arith.constant 0 : index
    %c0_5 = arith.constant 0 : index
    %4 = vector.load %arg5[%c0_3, %c0_4, %c0_5] : memref<1x8x169xf32, #tpu.memory_space<vmem>>, vector<1x8x169xf32>
    %c1 = arith.constant 1 : index
    %5 = memref.load %arg3[%c1] : memref<4xf32, #tpu.memory_space<smem>>
    %6 = vector.broadcast %5 : f32 to vector<1x8x169xf32>
    %7 = arith.mulf %4, %6 : vector<1x8x169xf32>
    %8 = arith.addf %3, %7 : vector<1x8x169xf32>
    %c0_6 = arith.constant 0 : index
    %c0_7 = arith.constant 0 : index
    %c0_8 = arith.constant 0 : index
    %9 = vector.load %arg6[%c0_6, %c0_7, %c0_8] : memref<1x8x169xf32, #tpu.memory_space<vmem>>, vector<1x8x169xf32>
    %c2 = arith.constant 2 : index
    %10 = memref.load %arg3[%c2] : memref<4xf32, #tpu.memory_space<smem>>
    %11 = vector.broadcast %10 : f32 to vector<1x8x169xf32>
    %12 = arith.mulf %9, %11 : vector<1x8x169xf32>
    %c8_i32 = arith.constant 8 : i32
    %13 = arith.muli %arg2, %c8_i32 : i32
    %14 = tpu.iota {dimensions = array<i32: 1>} : vector<1x8x169xi32>
    %15 = vector.broadcast %13 : i32 to vector<1x8x169xi32>
    %16 = arith.addi %15, %14 : vector<1x8x169xi32>
    %c8_i32_9 = arith.constant 8 : i32
    %17 = vector.broadcast %c8_i32_9 : i32 to vector<1x8x169xi32>
    %18 = arith.cmpi slt, %16, %17 : vector<1x8x169xi32>
    %cst = arith.constant 0.000000e+00 : f32
    %19 = vector.broadcast %cst : f32 to vector<1x8x169xf32>
    %20 = arith.select %18, %12, %19 : vector<1x8x169xi1>, vector<1x8x169xf32>
    %21 = arith.addf %8, %20 : vector<1x8x169xf32>
    %c0_10 = arith.constant 0 : index
    %c0_11 = arith.constant 0 : index
    %c0_12 = arith.constant 0 : index
    %22 = vector.load %arg7[%c0_10, %c0_11, %c0_12] : memref<1x8x169xf32, #tpu.memory_space<vmem>>, vector<1x8x169xf32>
    %c3 = arith.constant 3 : index
    %23 = memref.load %arg3[%c3] : memref<4xf32, #tpu.memory_space<smem>>
    %24 = vector.broadcast %23 : f32 to vector<1x8x169xf32>
    %25 = arith.mulf %22, %24 : vector<1x8x169xf32>
    %26 = arith.addf %21, %25 : vector<1x8x169xf32>
    %c0_13 = arith.constant 0 : index
    %c0_14 = arith.constant 0 : index
    %c0_15 = arith.constant 0 : index
    %27 = vector.load %arg8[%c0_13, %c0_14, %c0_15] : memref<1x8x169xf32, #tpu.memory_space<vmem>>, vector<1x8x169xf32>
    tpu.vector_store %arg8[%c0_13, %c0_14, %c0_15], %26 {strides = array<i32>} : memref<1x8x169xf32, #tpu.memory_space<vmem>>, vector<1x8x169xf32>,
    return
  }
  func.func @transform_0(%arg0: i32, %arg1: i32, %arg2: i32, %arg3: memref<4xf32, #tpu.memory_space<smem>>) -> (i32, i32, i32) {
    %c0_i32 = arith.constant 0 : i32
    return %arg0, %arg2, %arg1 : i32, i32, i32
  }
  func.func @transform_1(%arg0: i32, %arg1: i32, %arg2: i32, %arg3: memref<4xf32, #tpu.memory_space<smem>>) -> (i32, i32, i32) {
    %c0_i32 = arith.constant 0 : i32
    return %arg0, %arg2, %arg1 : i32, i32, i32
  }
  func.func @transform_2(%arg0: i32, %arg1: i32, %arg2: i32, %arg3: memref<4xf32, #tpu.memory_space<smem>>) -> (i32, i32, i32) {
    %c0_i32 = arith.constant 0 : i32
    %0 = arith.minsi %arg2, %c0_i32 : i32
    %c0_i32_0 = arith.constant 0 : i32
    return %arg0, %0, %arg1 : i32, i32, i32
  }
  func.func @transform_3(%arg0: i32, %arg1: i32, %arg2: i32, %arg3: memref<4xf32, #tpu.memory_space<smem>>) -> (i32, i32, i32) {
    %c0_i32 = arith.constant 0 : i32
    return %arg0, %arg2, %arg1 : i32, i32, i32
  }
  func.func @transform_4(%arg0: i32, %arg1: i32, %arg2: i32, %arg3: memref<4xf32, #tpu.memory_space<smem>>) -> (i32, i32, i32) {
    %c0_i32 = arith.constant 0 : i32
    return %arg0, %arg2, %arg1 : i32, i32, i32
  }
}

</mosaic_0001>

<bundles_post_ra>
// kernel: tpu_custom_call.1
= control target key start
LH: loop header
LB: loop body
LE: loop exit
PB: predicated region body
PF: predicated region fallthrough
CT: control target
= control target key end

     0   :  { %s950_s21 = smov [#allocation3]   ;;  %s1178_s0 = inlined_call_operand.vmem [shape: f32[4], index: 0, kind: input, shape index: {}]   ;;  %s1179_s1 = inlined_call_operand.hbm [shape: f32[2,16,169], index: 1, kind: input, shape index: {}, may-alias: {1,5}]   ;;  %s1180_s2 = inlined_call_operand.vmem [shape: f32[2,24,169], index: 2, kind: input, shape index: {}]   ;;  %s1181_s3 = inlined_call_operand.vmem [shape: f32[2,8,169], index: 3, kind: input, shape index: {}]   ;;  %s1182_s4 = inlined_call_operand.hbm [shape: f32[2,16,169], index: 4, kind: input, shape index: {}]   ;;  %s1183_s5 = inlined_call_operand.hbm [shape: f32[2,16,169], index: 5, kind: output, shape index: {}, may-alias: {1,5}]  }
   0x1   :  { %1188 = sst [smem:[#allocation18_spill]] %s1179_s1  ;;  %s11_s20 = sshll.u32 %s1178_s0, 4  ;;  %s12_s20 = int_to_ptr.vmem [resolvable:$true] %s11_s20 }
   0x2   :  { %14 = dma.vmem_to_smem %s12_s20, 16, %s950_s21, [#allocation2] }
   0x3   :  { %904 = dma.done.wait [#allocation2], 16 }
   0x4   :  { %905 = vsyncadd [#allocation2], 4294967280 }
   0x5   :  { %17 = sfence }
   0x6   :  { %18 = vsyncpa [#allocation5], 0 }
   0x7   :  { %20 = vsyncpa [#allocation5 + $0x1], 0 }
   0x8   :  { %21 = vsyncpa [#allocation8], 0 }
   0x9   :  { %23 = vsyncpa [#allocation8 + $0x1], 0 }
   0xa   :  { %24 = vsyncpa [#allocation6], 0 }
   0xb   :  { %26 = vsyncpa [#allocation6 + $0x1], 0  ;;  %s984_s22 = smov 0   ;;  %s986_s23 = smov 0  }
   0xc   :  { %s988_s24 = smov 0   ;;  %s990_s25 = smov 0  }
   0xd   :  { %s992_s0 = smov 0   ;;  %s994_s26 = smov 0  }
   0xe   :  { %s996_s27 = smov 0   ;;  %s998_s28 = smov 0  }
   0xf LB: > { %1189 = sst [smem:[#allocation14_spill]] %s940_s26  ;;  %s653_s29 = sadd.s32 4294967295, %s948_s28   ;;  %s948_s28 = sphi %s998_s28, %s32_s28   ;;  %s944_s27 = sphi %s996_s27, %s1204_s27   ;;  %s940_s26 = sphi %s994_s26, %s1203_s26   ;;  %s936_s0 = sphi %s992_s0, %s1202_s0   ;;  %s932_s25 = sphi %s990_s25, %s1201_s25   ;;  %s928_s24 = sphi %s988_s24, %s1207_s24   ;;  %s924_s23 = sphi %s986_s23, %s1206_s23   ;;  %s920_s22 = sphi %s984_s22, %s1205_s22  }
  0x10   : > { %1190 = sst [smem:[#allocation15_spill]] %s944_s27  ;;  %s654_s30 = sadd.s32 4294967294, %s948_s28  }
  0x11   : > { %s44_s6 = sadd.s32 1, %s940_s26  ;;  %s51_s7 = sadd.s32 1, %s944_s27 }
  0x12   : > { %p45_p0 = scmp.ge.s32.totalorder %s44_s6, 2  ;;  %s62_s8 = sadd.s32 1, %s928_s24 }
  0x13   : > { %p69_p1 = scmp.ne.s32.totalorder %s928_s24, %s924_s23  ;;  %p70_p2 = scmp.eq.s32.totalorder %s948_s28, 0 }
  0x14   : > { %s1209_s6 = smov (%p45_p0, %s44_s6), 0  ;;  %s1211_s7 = smov (!%p45_p0, %s51_s7), %s944_s27 }
  0x15   : > { %1191 = sst [smem:[#allocation16_spill]] %s1209_s6  ;;  %s56_s9 = ssub.s32 %s940_s26, %s1209_s6 }
  0x16   : > { %p1037_p3 = por %p70_p2, %p69_p1  ;;  %p53_p4 = scmp.ge.s32.totalorder %s1211_s7, 2 }
  0x17   : > { %p75_p5 = scmp.ne.s32.totalorder %s924_s23, %s920_s22  ;;  %p76_p6 = scmp.eq.s32.totalorder %s653_s29, 0 }
  0x18   : > { %p197_p7 = scmp.eq.s32.totalorder %s653_s29, 3  ;;  %s1213_s7 = smov (%p53_p4, %s1211_s7), 0 }
  0x19   : > { %1193 = sst [smem:[#allocation17_spill]] %s1213_s7  ;;  %p1045_p8 = por %p76_p6, %p75_p5 }
  0x1a   : > { %p1049_p9 = por %p197_p7, %p69_p1  ;;  %s55_s13 = ssub.s32 %s944_s27, %s1213_s7 }
  0x1b   : > { %p203_p10 = scmp.eq.s32.totalorder %s654_s30, 3  ;;  %s57_s14 = sor.u32 %s56_s9, %s55_s13 }
  0x1c   : > { %p60_p11 = scmp.eq.s32.totalorder %s57_s14, 0  ;;  %p705_p13 = scmp.lt.s32.totalorder %s948_s28, 4 }
  0x1d   : > { %p1055_p12 = por %p203_p10, %p75_p5  ;;  %s223_s16 = sand.u32 1, %s928_s24  }
  0x1e   : > { %s1062_s17 = scalar_select %p60_p11, %s928_s24, %s62_s8  }
  0x1f   : > { %s657_s18 = sshll.u32 %s223_s16, 4  ;;  %s658_s19 = sshll.u32 %s940_s26, 1 }
  0x20   : > { %s659_s20 = sshll.u32 %s944_s27, 2  ;;  %s227_s21 = scalar_lea.vmem [#allocation4], %s657_s18 }
  0x21   : > { %s240_s29 = sshll.u32 %s227_s21, 4  ;;  %s234_s7 = sadd.s32 %s659_s20, %s658_s19  ;;  %s241_s29 = int_to_ptr.vmem [resolvable:$true] %s240_s29 }
  0x22   : > { %s660_s30 = sshll.u32 %s234_s7, 3  ;;  %p1068_p0 = pnand %p705_p13, %p1037_p3 }
  0x23   : > { %s1198_s1 = sld [smem:[#allocation18_spill]]  ;;  %p665_p1 = scmp.ge.s32.totalorder %s948_s28, 1 }
  0x24   : > { %p307_p2 = scmp.lt.s32.totalorder %s948_s28, 5  ;;  %s224_s27 = scalar_lea.sflag [#allocation5], %s223_s16 }
  0x25   : > { %s298_s19 = scalar_lea.hbm %s1182_s4, %s660_s30  ;;  %s289_s21 = scalar_lea.vmem [#allocation7], %s657_s18 }
  0x26   : > { %p308_p4 = pnand %p665_p1, %p307_p2  ;;  %s300_s20 = sshll.u32 %s298_s19, 4  ;;  %s301_s20 = int_to_ptr.hbm [resolvable:$true] %s300_s20 }
  0x27   : > { %s302_s26 = sshll.u32 %s289_s21, 4  ;;  %s286_s13 = scalar_lea.sflag [#allocation8], %s223_s16  ;;  %s303_s26 = int_to_ptr.vmem [resolvable:$true] %s302_s26 }
  0x28   : > { %700 = dma.hbm_to_vmem [thread:$0]  (!%p1068_p0), %s301_s20, 256, %s303_s26, %s286_s13  }
  0x29   : > { %s236_s8 = scalar_lea.hbm %s1198_s1, %s660_s30  ;;  %311 = sbr.rel (%p308_p4) target bundleno = 79 (0x4f), region = 36 }
  0x2a   : > { %s238_s6 = sshll.u32 %s236_s8, 4  ;;  %s1085_s14 = sand.u32 (!%p308_p4), 1, %s924_s23   ;;  %s239_s6 = int_to_ptr.hbm [resolvable:$true] %s238_s6 }
  0x2b   : > { %697 = dma.hbm_to_vmem [thread:$0]  (!%p1068_p0), %s239_s6, 256, %s241_s29, %s224_s27  }
  0x2c   : > { %s1088_s27 = sshll.u32 (!%p308_p4), %s1085_s14, 4  ;;  %s314_s6 = scalar_lea.sflag (!%p308_p4), [#allocation5], %s1085_s14 }
  0x2d   : > { %s317_s29 = scalar_lea.vmem (!%p308_p4), [#allocation4], %s1088_s27 }
  0x2e   : > { %907 = dma.done.wait (%p1045_p8), %s314_s6, 256  }
  0x2f   : > { %909 = vsyncadd (%p1045_p8), %s314_s6, 4294967040  ;;  %s324_s26 = scalar_lea.sflag [#allocation8], %s1085_s14 }
  0x30   : > { %911 = dma.done.wait (%p1045_p8), %s324_s26, 256  }
  0x31   : > { %913 = vsyncadd (%p1045_p8), %s324_s26, 4294967040  ;;  %p388_p3 = scmp.lt.s32.totalorder %s936_s0, 1  ;;  %p390_p5 = scmp.lt.s32.totalorder %s932_s25, 2  ;;  %v442_v0 = vlaneseq  ;;  %v421_v2 = vld [vmem:[%s317_s29] sm:$0xff]  ;;  %v422_v4 = vld [vmem:[%s317_s29 + $0x8] sm:$0xff]  ;;  %vm460_vm1 = vcmask 334848  }
  0x32   : > { %p401_p6 = scmp.lt.s32.totalorder %s932_s25, 0  ;;  %s423_s8 = sld [smem:[#allocation3]] }
  0x33   : > { %s1105_s18 = scalar_select %p388_p3, %s936_s0, 1  ;;  %v443_v1 = vshrl.u32 %v442_v0, 7 }
  0x34   : > { %s391_s30 = scalar_select %p390_p5, %s932_s25, 2 }
  0x35   : > { %s687_s9 = smul.u32 6, %s1105_s18  ;;  %s677_s10 = sld [smem:[#allocation3 + $0x1]] }
  0x36   : > { %s669_s11 = sshll.u32 %s391_s30, 1  ;;  %s1110_s20 = sld [smem:[#allocation3 + $0x2]] }
  0x37   : > { %s397_s7 = sadd.s32 %s687_s9, %s669_s11  ;;  %s679_s26 = sshll.u32 %s932_s25, 3 }
  0x38   : > { %s670_s19 = sshll.u32 %s397_s7, 3  ;;  %v444_v3 = vstv %s679_s26  ;;  %s675_s1 = sshll.u32 %s1105_s18, 1  ;;  %v424_v7 = vstv %s423_s8 }
  0x39   : > { %s399_s6 = scalar_lea.vmem %s1180_s2, %s670_s19  ;;  %s1120_s30 = sld [smem:[#allocation3 + $0x3]]  ;;  %v445_v9 = vadd.s32 %v444_v3, %v443_v1  ;;  %v425_v10 = vmul.f32 %v424_v7, %v421_v2  ;;  %v426_v11 = vmul.f32 %v424_v7, %v422_v4 }
  0x3a   : > { %s402_s16 = scalar_select %p401_p6, %s932_s25, 0  ;;  %v427_v5 = vld [vmem:[%s399_s6] sm:$0xff]  ;;  %v428_v6 = vld [vmem:[%s399_s6 + $0x8] sm:$0xff] }
  0x3b   : > { %v430_v8 = vstv %s677_s10  ;;  %s682_s18 = sshll.u32 %s932_s25, 1  ;;  %s683_s11 = sshll.u32 %s936_s0, 2  ;;  %vm446_vm0 = vcmp.lt.s32.totalorder %v445_v9, 8 }
  0x3c   : > { %s1215_s16 = smov (!%p401_p6, %s402_s16), 0  ;;  %v431_v12 = vmul.f32 %v430_v8, %v427_v5  ;;  %v432_v13 = vmul.f32 %v430_v8, %v428_v6  ;;  %v438_v14 = vstv %s1110_s20  ;;  %s476_s19 = sadd.s32 %s683_s11, %s682_s18 }
  0x3d   : > { %s674_s9 = sshll.u32 %s1215_s16, 1  ;;  %s1199_s8 = scalar_lea.vmem [#allocation7], %s1088_s27 }
  0x3e   : > { %s413_s29 = sadd.s32 %s675_s1, %s674_s9  ;;  %v451_v15 = vld [vmem:[%s1199_s8] sm:$0xff]  ;;  %s1200_s10 = smov %s1199_s8  ;;  %v433_v18 = vadd.f32 %v431_v12, %v425_v10  ;;  %v434_v21 = vadd.f32 %v432_v13, %v426_v11 }
  0x3f   : > { %s676_s7 = sshll.u32 %s413_s29, 3  ;;  %v452_v16 = vld [vmem:[%s1200_s10 + $0x8] sm:$0xff]  ;;  %v454_v17 = vstv %s1120_s30  ;;  %s684_s16 = sshll.u32 %s476_s19, 3 }
  0x40   : > { %s415_s6 = scalar_lea.vmem %s1181_s3, %s676_s7  ;;  %s478_s0 = scalar_lea.hbm %s1183_s5, %s684_s16  ;;  %v455_v24 = vmul.f32 %v454_v17, %v451_v15  ;;  %v456_v25 = vmul.f32 %v454_v17, %v452_v16 }
  0x41   : > { %v435_v19 = vld [vmem:[%s415_s6] sm:$0xff]  ;;  %v436_v20 = vld [vmem:[%s415_s6 + $0x8] sm:$0xff]  ;;  %s385_s20 = scalar_lea.vmem [#allocation9], %s1088_s27  ;;  %s482_s30 = sshll.u32 %s478_s0, 4  ;;  %s483_s30 = int_to_ptr.hbm [resolvable:$true] %s482_s30 }
  0x42   : > { %v439_v22 = vmul.f32 %v438_v14, %v435_v19  ;;  %v440_v23 = vmul.f32 %v438_v14, %v436_v20  ;;  %s480_s26 = sshll.u32 %s385_s20, 4  ;;  %s463_s9 = scalar_lea.sflag [#allocation6], %s1085_s14  ;;  %s481_s26 = int_to_ptr.vmem [resolvable:$true] %s480_s26 }
  0x43   : > { %s858_s18 = sshra.s32 %s483_s30, 4  ;;  %s864_s7 = scalar_lea.hbm %s1183_s5, 64  ;;  %s859_s18 = int_to_ptr.hbm [resolvable:$true] %s858_s18 }
  0x44   : > { %v447_v26 = vsel %vm446_vm0, %v439_v22, 0.0  ;;  %v448_v27 = vsel %vm446_vm0, %v440_v23, 0.0  ;;  %s860_s29 = scalar_lea.hbm %s859_s18, 16  ;;  %p865_p11 = scmp.lt.s32.totalorder %s859_s18, %s1183_s5 }
  0x45   : > { %v449_v28 = vadd.f32 %v447_v26, %v433_v18  ;;  %v450_v29 = vadd.f32 %v448_v27, %v434_v21  ;;  %p861_p7 = scmp.ne.s32.totalorder %s859_s18, %s860_s29  ;;  %p866_p13 = scmp.lt.s32.totalorder %s864_s7, %s860_s29 }
  0x47   : > { %v457_v30 = vadd.f32 %v455_v24, %v449_v28  ;;  %v458_v31 = vadd.f32 %v456_v25, %v450_v29  ;;  %p862_p8 = pnand %p861_p7, %p1049_p9  ;;  %p867_p0 = por %p866_p13, %p865_p11 }
  0x49   : > { %459 = vst [vmem:[%s385_s20] sm:$0xff] %v457_v30  ;;  %p863_p10 = pneg %p862_p8 }
  0x4a   : > { %461 = vst.msk [vmem:[%s385_s20 + $0x8] sm:$0xff] %vm460_vm1, %v458_v31 }
  0x4b   : > { %p868_p1 = pnand %p867_p0, %p863_p10 }
  0x4d   : > { %871 = shalt.err (!%p868_p1)
}
  0x4e   : > { %692 = dma.vmem_to_hbm [thread:$0]  (%p1049_p9), %s481_s26, 256, %s483_s30, %s463_s9  }
  0x4f PF: > { %p706_p2 = scmp.ge.s32.totalorder %s948_s28, 2  ;;  %s494_s14 = sand.u32 1, %s920_s22  }
  0x50   : > { %s495_s13 = scalar_lea.sflag [#allocation6], %s494_s14 }
  0x51   : > { %p702_p4 = pnand %p706_p2, %p1055_p12 }
  0x53   : > { %p703_p3 = pneg %p702_p4 }
  0x55   : > { %915 = dma.done.wait (%p703_p3), %s495_s13, 256  }
  0x56   : > { %917 = vsyncadd (%p703_p3), %s495_s13, 4294967040  ;;  %s32_s28 = sadd.s32 1, %s948_s28   ;;  %s1201_s25 = sld [smem:[#allocation14_spill]] }
  0x57   : > { %p29_p5 = scmp.ge.s32.totalorder %s32_s28, 6   ;;  %s1202_s0 = sld [smem:[#allocation15_spill]] }
  0x58   : > { %s1203_s26 = sld [smem:[#allocation16_spill]]  ;;  %s1205_s22 = smov %s924_s23 }
  0x59   : > { %s1204_s27 = sld [smem:[#allocation17_spill]]  ;;  %s1206_s23 = smov %s928_s24 }
  0x5a   : > { %s1207_s24 = smov %s1062_s17  ;;  %31 = sbr.rel (!%p29_p5) target bundleno = 15 (0xf), region = 100 }
  0x5f   :  { %501 = vsyncpa [#allocation5], 1 }
  0x60   :  { %503 = vsyncpa [#allocation5 + $0x1], 1 }
  0x61   :  { %504 = vsyncpa [#allocation8], 1 }
  0x62   :  { %506 = vsyncpa [#allocation8 + $0x1], 1 }
  0x63   :  { %507 = vsyncpa [#allocation6], 1 }
  0x64   :  { %509 = vsyncpa [#allocation6 + $0x1], 1 }

</bundles_post_ra>
